<compile_context>
chip_gen: v6e
topology: v6e:2x2x1
jax: 0.10.0
libtpu: 0.0.40
codegen_flags: <defaults>
</compile_context>

<pallas_src>
import functools

import jax
import jax.numpy as jnp
from jax.experimental import pallas as pl
from jax.experimental.pallas import tpu as pltpu

NUM_CLS = 18          # bin_class_conv output channels
NUM_REG = 36          # reg_conv output channels
HEAD_PAD = 128        # lane-dense padded head width (18 cls + 36 reg + 74 zero pad)


# -----------------------------------------------------------------------------
# small helpers
# -----------------------------------------------------------------------------
def _pick(dim, candidates):
    """Largest candidate tile that divides `dim`; fall back to the full dim."""
    for c in candidates:
        if c <= dim and dim % c == 0:
            return c
    return dim


def _vmem_limit(block_bytes):
    """Tile-footprint-derived VMEM budget (+slack), clamped to be v7x-safe (<=48MiB)."""
    return int(min(max(block_bytes + 4 * 1024 * 1024, 8 * 1024 * 1024),
                   48 * 1024 * 1024))


# -----------------------------------------------------------------------------
# Tiled matmul (+bias, +activation) kernel — used for the fused 1x1 heads
# -----------------------------------------------------------------------------
def _matmul_bias_act_kernel(x_ref, w_ref, b_ref, o_ref, acc_ref, *, activation):
    @pl.when(pl.program_id(2) == 0)
    def _init():
        acc_ref[...] = jnp.zeros_like(acc_ref)

    acc_ref[...] += jnp.dot(x_ref[...], w_ref[...],
                            preferred_element_type=jnp.float32)

    @pl.when(pl.program_id(2) == pl.num_programs(2) - 1)
    def _finalize():
        acc = acc_ref[...] + b_ref[...]          # bias only on the final K step
        if activation == "relu":
            acc = jnp.maximum(acc, 0.0)
        elif activation == "softmax_cls":
            # softmax over the first NUM_CLS lanes (cls head, matches Softmax(dim=1));
            # remaining lanes (reg head + zero padding) pass through linearly.
            col = jax.lax.broadcasted_iota(jnp.int32, acc.shape, 1)
            is_cls = col < NUM_CLS
            logits = jnp.where(is_cls, acc, -jnp.inf)
            m = jnp.max(logits, axis=-1, keepdims=True)
            e = jnp.where(is_cls, jnp.exp(logits - m), 0.0)
            denom = jnp.sum(e, axis=-1, keepdims=True)
            soft = e * pl.reciprocal(denom, approx=True)
            acc = jnp.where(is_cls, soft, acc)
        o_ref[...] = acc.astype(o_ref.dtype)


def matmul_bias_act(x, w, b, activation=None, out_dtype=jnp.float32):
    """(M,K)@(K,N)+b with fused activation. Tiled (N,M,K) grid, f32 VMEM accumulator."""
    m, k = x.shape
    _, n = w.shape
    tm = _pick(m, (512, 256, 128, 64, 32, 16, 8))
    tn = _pick(n, (256, 128))
    tk = _pick(k, (256, 512, 128, 64, 32, 16, 8))
    if activation == "softmax_cls":
        assert tn == n, "cls-softmax head needs all output channels in one N tile"

    block_bytes = (2 * (tm * tk * x.dtype.itemsize + tk * tn * w.dtype.itemsize
                        + tn * 4 + tm * tn * jnp.dtype(out_dtype).itemsize)
                   + tm * tn * 4)
    kernel = functools.partial(_matmul_bias_act_kernel, activation=activation)
    # N-major grid so the (tk,tn) weight block is reused across consecutive M tiles;
    # K (reduction) stays last and is marked "arbitrary".
    return pl.pallas_call(
        kernel,
        out_shape=jax.ShapeDtypeStruct((m, n), out_dtype),
        grid=(n // tn, m // tm, k // tk),
        in_specs=[
            pl.BlockSpec((tm, tk), lambda j, i, kk: (i, kk)),
            pl.BlockSpec((tk, tn), lambda j, i, kk: (kk, j)),
            pl.BlockSpec((1, tn), lambda j, i, kk: (0, j)),
        ],
        out_specs=pl.BlockSpec((tm, tn), lambda j, i, kk: (i, j)),
        scratch_shapes=[pltpu.VMEM((tm, tn), jnp.float32)],
        compiler_params=pltpu.CompilerParams(
            dimension_semantics=("parallel", "parallel", "arbitrary"),
            vmem_limit_bytes=_vmem_limit(block_bytes)),
    )(x, w, b.reshape(1, n))


# -----------------------------------------------------------------------------
# 3x3 conv (stride 1, pad 1) — 9-tap accumulation, no im2col materialization
# -----------------------------------------------------------------------------
def _conv3x3_kernel(x_ref, w_ref, b_ref, o_ref, *, width, activation):
    # x_ref: (H+2, W+2, Cin) full padded image (resident across the inner grid axes)
    # w_ref: (9, Cin, tCout)   b_ref: (1, tCout)   o_ref: (W, tCout) — one output row
    r = pl.program_id(2)                      # output row index
    acc = jnp.zeros(o_ref.shape, jnp.float32)
    for dh in range(3):
        row = x_ref[r + dh]                   # (W+2, Cin), loaded once, reused 3x
        for dw in range(3):
            xs = row[dw:dw + width, :]        # (W, Cin) tap window
            acc = acc + jnp.dot(xs, w_ref[dh * 3 + dw],
                                preferred_element_type=jnp.float32)
    acc = acc + b_ref[...]
    if activation == "relu":
        acc = jnp.maximum(acc, 0.0)
    o_ref[...] = acc.astype(o_ref.dtype)


def conv3x3(x, w9, b, activation="relu", out_dtype=jnp.bfloat16):
    """3x3 / stride 1 / pad 1 conv.  x: (N,H,W,Cin) bf16, w9: (9,Cin,Cout) bf16."""
    n, h, wd, cin = x.shape
    cout = w9.shape[-1]
    xp = jnp.pad(x, ((0, 0), (1, 1), (1, 1), (0, 0)))       # halo: single copy in HBM
    hp, wp = h + 2, wd + 2
    tco = _pick(cout, (256, 128, 64))

    block_bytes = (2 * (hp * wp * cin * 2 + 9 * cin * tco * 2 + tco * 4 + wd * tco * 2)
                   + 16 * wd * tco * 4)
    kernel = functools.partial(_conv3x3_kernel, width=wd, activation=activation)
    # grid: (batch, Cout tiles, output rows). The weight block is resident across rows,
    # the padded image is resident across both inner axes (fetched once per image).
    return pl.pallas_call(
        kernel,
        out_shape=jax.ShapeDtypeStruct((n, h, wd, cout), out_dtype),
        grid=(n, cout // tco, h),
        in_specs=[
            pl.BlockSpec((None, hp, wp, cin), lambda b_, j, r: (b_, 0, 0, 0)),
            pl.BlockSpec((9, cin, tco), lambda b_, j, r: (0, 0, j)),
            pl.BlockSpec((1, tco), lambda b_, j, r: (0, j)),
        ],
        out_specs=pl.BlockSpec((None, None, wd, tco), lambda b_, j, r: (b_, r, 0, j)),
        compiler_params=pltpu.CompilerParams(
            dimension_semantics=("parallel", "parallel", "parallel"),
            vmem_limit_bytes=_vmem_limit(block_bytes)),
    )(xp, w9, b.reshape(1, cout))


# -----------------------------------------------------------------------------
# 2x2 / stride-2 max pool — tiled, window axes reduced in-kernel
# -----------------------------------------------------------------------------
def _maxpool_kernel(x_ref, o_ref):
    v = x_ref[...]                      # (tr, 2, Wo, 2, C)
    v = jnp.max(v, axis=1)              # max over the two pooled rows
    o_ref[...] = jnp.max(v, axis=2)     # max over the two pooled cols -> (tr, Wo, C)


def maxpool2x2(x):
    """2x2 / stride-2 max pool, x: (N,H,W,C) (even H/W in this network)."""
    n, h, w, c = x.shape
    ho, wo = h // 2, w // 2
    xr = x.reshape(n * ho, 2, wo, 2, c)           # zero-copy reshape in HBM
    rows = n * ho
    tr = _pick(rows, (256, 128, 64, 32, 16, 8, 4, 2, 1))
    block_bytes = 2 * (tr * 2 * wo * 2 * c + tr * wo * c) * x.dtype.itemsize
    out = pl.pallas_call(
        _maxpool_kernel,
        out_shape=jax.ShapeDtypeStruct((rows, wo, c), x.dtype),
        grid=(rows // tr,),
        in_specs=[pl.BlockSpec((tr, 2, wo, 2, c), lambda i: (i, 0, 0, 0, 0))],
        out_specs=pl.BlockSpec((tr, wo, c), lambda i: (i, 0, 0)),
        compiler_params=pltpu.CompilerParams(
            dimension_semantics=("parallel",),
            vmem_limit_bytes=_vmem_limit(block_bytes)),
    )(xr)
    return out.reshape(n, ho, wo, c)


# -----------------------------------------------------------------------------
# Parameters (deterministic init; shapes follow torchvision VGG16 features[:30])
# -----------------------------------------------------------------------------
def _init_conv(key, kh, kw, cin, cout):
    wkey, bkey = jax.random.split(key)
    fan_in = kh * kw * cin
    w = jax.random.normal(wkey, (kh, kw, cin, cout), jnp.float32) * jnp.sqrt(2.0 / fan_in)
    b = jax.random.normal(bkey, (cout,), jnp.float32) * 0.01
    return w, b


_VGG16_FEATURES_CFG = [
    (3, 64), (64, 64), "M",
    (64, 128), (128, 128), "M",
    (128, 256), (256, 256), (256, 256), "M",
    (256, 512), (512, 512), (512, 512), "M",
    (512, 512), (512, 512), (512, 512),          # features[:30] -> no final pool
]


def _prep_conv3x3(w, b, pad_cin_to=None):
    """(3,3,Cin,Cout) f32 -> tap-major (9, Cin', Cout) bf16 weights (+ f32 bias)."""
    if pad_cin_to is not None and pad_cin_to > w.shape[2]:
        w = jnp.pad(w, ((0, 0), (0, 0), (0, pad_cin_to - w.shape[2]), (0, 0)))
    kh, kw, cin, cout = w.shape
    return w.reshape(kh * kw, cin, cout).astype(jnp.bfloat16), b


def init_params(key):
    params = {"features": []}
    first = True
    for item in _VGG16_FEATURES_CFG:
        if item == "M":
            params["features"].append("M")
            continue
        key, sub = jax.random.split(key)
        cin, cout = item
        w, b = _init_conv(sub, 3, 3, cin, cout)
        # pad the first layer's Cin 3 -> 8 (zero channels) for an MXU-friendlier K
        params["features"].append(_prep_conv3x3(w, b, pad_cin_to=8 if first else None))
        first = False

    key, sub = jax.random.split(key)
    w, b = _init_conv(sub, 3, 3, 512, 512)
    params["conv3by3"] = _prep_conv3x3(w, b)

    # fused lane-dense head: lanes [0:18) cls, [18:54) reg, [54:128) zero padding
    key, csub = jax.random.split(key)
    wc, bc = _init_conv(csub, 1, 1, 512, NUM_CLS)
    key, rsub = jax.random.split(key)
    wr, br = _init_conv(rsub, 1, 1, 512, NUM_REG)
    w_head = jnp.zeros((512, HEAD_PAD), jnp.float32)
    w_head = w_head.at[:, :NUM_CLS].set(wc.reshape(512, NUM_CLS))
    w_head = w_head.at[:, NUM_CLS:NUM_CLS + NUM_REG].set(wr.reshape(512, NUM_REG))
    b_head = jnp.zeros((HEAD_PAD,), jnp.float32)
    b_head = b_head.at[:NUM_CLS].set(bc).at[NUM_CLS:NUM_CLS + NUM_REG].set(br)
    params["head"] = (w_head.astype(jnp.bfloat16), b_head)
    return params


# -----------------------------------------------------------------------------
# RPN forward (matches the PyTorch module's forward)
# -----------------------------------------------------------------------------
def rpn_forward(img_nchw, params):
    x = jnp.transpose(img_nchw, (0, 2, 3, 1)).astype(jnp.bfloat16)    # NCHW -> NHWC
    pad_c = max(0, 8 - x.shape[-1])
    x = jnp.pad(x, ((0, 0), (0, 0), (0, 0), (0, pad_c)))              # Cin 3 -> 8

    # self.features = vgg16.features[:30]  (conv+ReLU blocks, 4 max-pools)
    for layer in params["features"]:
        if isinstance(layer, str):
            x = maxpool2x2(x)
        else:
            w9, b = layer
            x = conv3x3(x, w9, b, activation="relu")

    # self.conv3by3 = Conv2d(512,512,3,1,1) + ReLU
    w9, b = params["conv3by3"]
    x = conv3x3(x, w9, b, activation="relu")

    n, f_height, f_width, feat_c = x.shape
    # fused heads: bin_class_conv (1x1 -> 18 + Softmax(dim=1)) and reg_conv (1x1 -> 36)
    # as one lane-dense matmul (output padded to 128 lanes).
    w_head, b_head = params["head"]
    out = matmul_bias_act(x.reshape(n * f_height * f_width, feat_c),
                          w_head, b_head, activation="softmax_cls",
                          out_dtype=jnp.float32)
    out = out.reshape(n, f_height, f_width, HEAD_PAD)
    cls = jnp.transpose(out[..., :NUM_CLS], (0, 3, 1, 2))                   # NCHW
    reg = jnp.transpose(out[..., NUM_CLS:NUM_CLS + NUM_REG], (0, 3, 1, 2))  # NCHW
    # TODO(synk): self.roi_pooling (AdaptiveAvgPool2d((7,7))) is defined in __init__
    # but never used in forward(), so it is intentionally not implemented here.
    return f_width, f_height, cls, reg


# -----------------------------------------------------------------------------
if __name__ == "__main__":
    key = jax.random.PRNGKey(0)
    pkey, xkey = jax.random.split(key)
    params = init_params(pkey)

    # Small input consistent with the module: NCHW, 3 channels, 32x32 spatial
    # (4 max-pools -> 2x2 feature map).
    img = jax.random.normal(xkey, (2, 3, 32, 32), jnp.float32)

    f_width, f_height, cls, reg = rpn_forward(img, params)
    cls = jax.block_until_ready(cls)
    reg = jax.block_until_ready(reg)

    assert (f_width, f_height) == (2, 2)
    assert cls.shape == (2, NUM_CLS, 2, 2)
    assert reg.shape == (2, NUM_REG, 2, 2)
    # channel softmax over the 18 cls channels sums to 1 (approx reciprocal -> loose tol)
    assert jnp.allclose(jnp.sum(cls, axis=1), 1.0, atol=1e-2)
    assert bool(jnp.all(jnp.isfinite(reg)))

    print("KERNEL_OK")
</pallas_src>

<mosaic_0001>
module attributes {stable_mosaic.version = 11 : i64} {
  func.func @_conv3x3_kernel(%arg0: i32, %arg1: i32, %arg2: i32, %arg3: memref<1x34x34x8xbf16, #tpu.memory_space<vmem>>, %arg4: memref<9x8x64xbf16, #tpu.memory_space<vmem>>, %arg5: memref<1x64xf32, #tpu.memory_space<vmem>>, %arg6: memref<1x1x32x64xbf16, #tpu.memory_space<vmem>>) attributes {dimension_semantics = [#tpu.dimension_semantics<parallel>, #tpu.dimension_semantics<parallel>, #tpu.dimension_semantics<parallel>], iteration_bounds = array<i64: 2, 1, 32>, scalar_prefetch = 0 : i64, scratch_operands = 0 : i64, tpu.core_type = #tpu.core_type<tc>, window_params = [{transform_indices = @transform_0, window_bounds = array<i64: 1, 34, 34, 8>}, {transform_indices = @transform_1, window_bounds = array<i64: 9, 8, 64>}, {transform_indices = @transform_2, window_bounds = array<i64: 1, 64>}, {transform_indices = @transform_3, window_bounds = array<i64: 1, 1, 32, 64>}]} {
    %cst = arith.constant 0.000000e+00 : f32
    %0 = vector.broadcast %cst : f32 to vector<32x64xf32>
    %c0_i32 = arith.constant 0 : i32
    %1 = arith.addi %arg2, %c0_i32 : i32
    %c0 = arith.constant 0 : index
    %2 = arith.index_cast %1 : i32 to index
    %c0_0 = arith.constant 0 : index
    %c0_1 = arith.constant 0 : index
    %3 = vector.load %arg3[%c0, %2, %c0_0, %c0_1] : memref<1x34x34x8xbf16, #tpu.memory_space<vmem>>, vector<1x1x34x8xbf16>
    %4 = vector.shape_cast %3 : vector<1x1x34x8xbf16> to vector<34x8xbf16>
    %5 = vector.extract_strided_slice %4 {offsets = [0, 0], sizes = [32, 8], strides = [1, 1]} : vector<34x8xbf16> to vector<32x8xbf16>
    %c0_2 = arith.constant 0 : index
    %c0_3 = arith.constant 0 : index
    %c0_4 = arith.constant 0 : index
    %6 = vector.load %arg4[%c0_2, %c0_3, %c0_4] : memref<9x8x64xbf16, #tpu.memory_space<vmem>>, vector<1x8x64xbf16>
    %7 = vector.shape_cast %6 : vector<1x8x64xbf16> to vector<8x64xbf16>
    %cst_5 = arith.constant dense<0.000000e+00> : vector<32x64xf32>
    %8 = tpu.matmul %5, %7, %cst_5 {dimension_numbers = #tpu.dot_dimension_numbers<[1], [0], [0], [1], [0, 0, 1, 1], [], []>} : vector<32x8xbf16>, vector<8x64xbf16>, vector<32x64xf32> -> vector<32x64xf32>
    %9 = arith.addf %0, %8 : vector<32x64xf32>
    %10 = vector.extract_strided_slice %4 {offsets = [1, 0], sizes = [32, 8], strides = [1, 1]} : vector<34x8xbf16> to vector<32x8xbf16>
    %c1 = arith.constant 1 : index
    %c0_6 = arith.constant 0 : index
    %c0_7 = arith.constant 0 : index
    %11 = vector.load %arg4[%c1, %c0_6, %c0_7] : memref<9x8x64xbf16, #tpu.memory_space<vmem>>, vector<1x8x64xbf16>
    %12 = vector.shape_cast %11 : vector<1x8x64xbf16> to vector<8x64xbf16>
    %cst_8 = arith.constant dense<0.000000e+00> : vector<32x64xf32>
    %13 = tpu.matmul %10, %12, %cst_8 {dimension_numbers = #tpu.dot_dimension_numbers<[1], [0], [0], [1], [0, 0, 1, 1], [], []>} : vector<32x8xbf16>, vector<8x64xbf16>, vector<32x64xf32> -> vector<32x64xf32>
    %14 = arith.addf %9, %13 : vector<32x64xf32>
    %15 = vector.extract_strided_slice %4 {offsets = [2, 0], sizes = [32, 8], strides = [1, 1]} : vector<34x8xbf16> to vector<32x8xbf16>
    %c2 = arith.constant 2 : index
    %c0_9 = arith.constant 0 : index
    %c0_10 = arith.constant 0 : index
    %16 = vector.load %arg4[%c2, %c0_9, %c0_10] : memref<9x8x64xbf16, #tpu.memory_space<vmem>>, vector<1x8x64xbf16>
    %17 = vector.shape_cast %16 : vector<1x8x64xbf16> to vector<8x64xbf16>
    %cst_11 = arith.constant dense<0.000000e+00> : vector<32x64xf32>
    %18 = tpu.matmul %15, %17, %cst_11 {dimension_numbers = #tpu.dot_dimension_numbers<[1], [0], [0], [1], [0, 0, 1, 1], [], []>} : vector<32x8xbf16>, vector<8x64xbf16>, vector<32x64xf32> -> vector<32x64xf32>
    %19 = arith.addf %14, %18 : vector<32x64xf32>
    %c1_i32 = arith.constant 1 : i32
    %20 = arith.addi %arg2, %c1_i32 : i32
    %c0_12 = arith.constant 0 : index
    %21 = arith.index_cast %20 : i32 to index
    %c0_13 = arith.constant 0 : index
    %c0_14 = arith.constant 0 : index
    %22 = vector.load %arg3[%c0_12, %21, %c0_13, %c0_14] : memref<1x34x34x8xbf16, #tpu.memory_space<vmem>>, vector<1x1x34x8xbf16>
    %23 = vector.shape_cast %22 : vector<1x1x34x8xbf16> to vector<34x8xbf16>
    %24 = vector.extract_strided_slice %23 {offsets = [0, 0], sizes = [32, 8], strides = [1, 1]} : vector<34x8xbf16> to vector<32x8xbf16>
    %c3 = arith.constant 3 : index
    %c0_15 = arith.constant 0 : index
    %c0_16 = arith.constant 0 : index
    %25 = vector.load %arg4[%c3, %c0_15, %c0_16] : memref<9x8x64xbf16, #tpu.memory_space<vmem>>, vector<1x8x64xbf16>
    %26 = vector.shape_cast %25 : vector<1x8x64xbf16> to vector<8x64xbf16>
    %cst_17 = arith.constant dense<0.000000e+00> : vector<32x64xf32>
    %27 = tpu.matmul %24, %26, %cst_17 {dimension_numbers = #tpu.dot_dimension_numbers<[1], [0], [0], [1], [0, 0, 1, 1], [], []>} : vector<32x8xbf16>, vector<8x64xbf16>, vector<32x64xf32> -> vector<32x64xf32>
    %28 = arith.addf %19, %27 : vector<32x64xf32>
    %29 = vector.extract_strided_slice %23 {offsets = [1, 0], sizes = [32, 8], strides = [1, 1]} : vector<34x8xbf16> to vector<32x8xbf16>
    %c4 = arith.constant 4 : index
    %c0_18 = arith.constant 0 : index
    %c0_19 = arith.constant 0 : index
    %30 = vector.load %arg4[%c4, %c0_18, %c0_19] : memref<9x8x64xbf16, #tpu.memory_space<vmem>>, vector<1x8x64xbf16>
    %31 = vector.shape_cast %30 : vector<1x8x64xbf16> to vector<8x64xbf16>
    %cst_20 = arith.constant dense<0.000000e+00> : vector<32x64xf32>
    %32 = tpu.matmul %29, %31, %cst_20 {dimension_numbers = #tpu.dot_dimension_numbers<[1], [0], [0], [1], [0, 0, 1, 1], [], []>} : vector<32x8xbf16>, vector<8x64xbf16>, vector<32x64xf32> -> vector<32x64xf32>
    %33 = arith.addf %28, %32 : vector<32x64xf32>
    %34 = vector.extract_strided_slice %23 {offsets = [2, 0], sizes = [32, 8], strides = [1, 1]} : vector<34x8xbf16> to vector<32x8xbf16>
    %c5 = arith.constant 5 : index
    %c0_21 = arith.constant 0 : index
    %c0_22 = arith.constant 0 : index
    %35 = vector.load %arg4[%c5, %c0_21, %c0_22] : memref<9x8x64xbf16, #tpu.memory_space<vmem>>, vector<1x8x64xbf16>
    %36 = vector.shape_cast %35 : vector<1x8x64xbf16> to vector<8x64xbf16>
    %cst_23 = arith.constant dense<0.000000e+00> : vector<32x64xf32>
    %37 = tpu.matmul %34, %36, %cst_23 {dimension_numbers = #tpu.dot_dimension_numbers<[1], [0], [0], [1], [0, 0, 1, 1], [], []>} : vector<32x8xbf16>, vector<8x64xbf16>, vector<32x64xf32> -> vector<32x64xf32>
    %38 = arith.addf %33, %37 : vector<32x64xf32>
    %c2_i32 = arith.constant 2 : i32
    %39 = arith.addi %arg2, %c2_i32 : i32
    %c0_24 = arith.constant 0 : index
    %40 = arith.index_cast %39 : i32 to index
    %c0_25 = arith.constant 0 : index
    %c0_26 = arith.constant 0 : index
    %41 = vector.load %arg3[%c0_24, %40, %c0_25, %c0_26] : memref<1x34x34x8xbf16, #tpu.memory_space<vmem>>, vector<1x1x34x8xbf16>
    %42 = vector.shape_cast %41 : vector<1x1x34x8xbf16> to vector<34x8xbf16>
    %43 = vector.extract_strided_slice %42 {offsets = [0, 0], sizes = [32, 8], strides = [1, 1]} : vector<34x8xbf16> to vector<32x8xbf16>
    %c6 = arith.constant 6 : index
    %c0_27 = arith.constant 0 : index
    %c0_28 = arith.constant 0 : index
    %44 = vector.load %arg4[%c6, %c0_27, %c0_28] : memref<9x8x64xbf16, #tpu.memory_space<vmem>>, vector<1x8x64xbf16>
    %45 = vector.shape_cast %44 : vector<1x8x64xbf16> to vector<8x64xbf16>
    %cst_29 = arith.constant dense<0.000000e+00> : vector<32x64xf32>
    %46 = tpu.matmul %43, %45, %cst_29 {dimension_numbers = #tpu.dot_dimension_numbers<[1], [0], [0], [1], [0, 0, 1, 1], [], []>} : vector<32x8xbf16>, vector<8x64xbf16>, vector<32x64xf32> -> vector<32x64xf32>
    %47 = arith.addf %38, %46 : vector<32x64xf32>
    %48 = vector.extract_strided_slice %42 {offsets = [1, 0], sizes = [32, 8], strides = [1, 1]} : vector<34x8xbf16> to vector<32x8xbf16>
    %c7 = arith.constant 7 : index
    %c0_30 = arith.constant 0 : index
    %c0_31 = arith.constant 0 : index
    %49 = vector.load %arg4[%c7, %c0_30, %c0_31] : memref<9x8x64xbf16, #tpu.memory_space<vmem>>, vector<1x8x64xbf16>
    %50 = vector.shape_cast %49 : vector<1x8x64xbf16> to vector<8x64xbf16>
    %cst_32 = arith.constant dense<0.000000e+00> : vector<32x64xf32>
    %51 = tpu.matmul %48, %50, %cst_32 {dimension_numbers = #tpu.dot_dimension_numbers<[1], [0], [0], [1], [0, 0, 1, 1], [], []>} : vector<32x8xbf16>, vector<8x64xbf16>, vector<32x64xf32> -> vector<32x64xf32>
    %52 = arith.addf %47, %51 : vector<32x64xf32>
    %53 = vector.extract_strided_slice %42 {offsets = [2, 0], sizes = [32, 8], strides = [1, 1]} : vector<34x8xbf16> to vector<32x8xbf16>
    %c8 = arith.constant 8 : index
    %c0_33 = arith.constant 0 : index
    %c0_34 = arith.constant 0 : index
    %54 = vector.load %arg4[%c8, %c0_33, %c0_34] : memref<9x8x64xbf16, #tpu.memory_space<vmem>>, vector<1x8x64xbf16>
    %55 = vector.shape_cast %54 : vector<1x8x64xbf16> to vector<8x64xbf16>
    %cst_35 = arith.constant dense<0.000000e+00> : vector<32x64xf32>
    %56 = tpu.matmul %53, %55, %cst_35 {dimension_numbers = #tpu.dot_dimension_numbers<[1], [0], [0], [1], [0, 0, 1, 1], [], []>} : vector<32x8xbf16>, vector<8x64xbf16>, vector<32x64xf32> -> vector<32x64xf32>
    %57 = arith.addf %52, %56 : vector<32x64xf32>
    %c0_36 = arith.constant 0 : index
    %c0_37 = arith.constant 0 : index
    %58 = vector.load %arg5[%c0_36, %c0_37] : memref<1x64xf32, #tpu.memory_space<vmem>>, vector<1x64xf32>
    %59 = vector.broadcast %58 : vector<1x64xf32> to vector<32x64xf32>
    %60 = arith.addf %57, %59 : vector<32x64xf32>
    %cst_38 = arith.constant 0.000000e+00 : f32
    %61 = vector.broadcast %cst_38 : f32 to vector<32x64xf32>
    %62 = arith.maximumf %60, %61 : vector<32x64xf32>
    %63 = arith.truncf %62 : vector<32x64xf32> to vector<32x64xbf16>
    %c0_39 = arith.constant 0 : index
    %c0_40 = arith.constant 0 : index
    %c0_41 = arith.constant 0 : index
    %c0_42 = arith.constant 0 : index
    %64 = vector.load %arg6[%c0_39, %c0_40, %c0_41, %c0_42] : memref<1x1x32x64xbf16, #tpu.memory_space<vmem>>, vector<1x1x32x64xbf16>
    %65 = vector.shape_cast %64 : vector<1x1x32x64xbf16> to vector<32x64xbf16>
    %66 = vector.shape_cast %63 : vector<32x64xbf16> to vector<1x1x32x64xbf16>
    tpu.vector_store %arg6[%c0_39, %c0_40, %c0_41, %c0_42], %66 {strides = array<i32>} : memref<1x1x32x64xbf16, #tpu.memory_space<vmem>>, vector<1x1x32x64xbf16>,
    return
  }
  func.func @transform_0(%arg0: i32, %arg1: i32, %arg2: i32) -> (i32, i32, i32, i32) {
    %c0_i32 = arith.constant 0 : i32
    %c0_i32_0 = arith.constant 0 : i32
    %c0_i32_1 = arith.constant 0 : i32
    %c0_i32_2 = arith.constant 0 : i32
    return %arg0, %c0_i32, %c0_i32_0, %c0_i32_1 : i32, i32, i32, i32
  }
  func.func @transform_1(%arg0: i32, %arg1: i32, %arg2: i32) -> (i32, i32, i32) {
    %c0_i32 = arith.constant 0 : i32
    %c0_i32_0 = arith.constant 0 : i32
    %c0_i32_1 = arith.constant 0 : i32
    return %c0_i32, %c0_i32_0, %arg1 : i32, i32, i32
  }
  func.func @transform_2(%arg0: i32, %arg1: i32, %arg2: i32) -> (i32, i32) {
    %c0_i32 = arith.constant 0 : i32
    %c0_i32_0 = arith.constant 0 : i32
    return %c0_i32, %arg1 : i32, i32
  }
  func.func @transform_3(%arg0: i32, %arg1: i32, %arg2: i32) -> (i32, i32, i32, i32) {
    %c0_i32 = arith.constant 0 : i32
    %c0_i32_0 = arith.constant 0 : i32
    return %arg0, %arg2, %c0_i32, %arg1 : i32, i32, i32, i32
  }
}

</mosaic_0001>

<bundles_post_ra>
// kernel: tpu_custom_call.1
= control target key start
LH: loop header
LB: loop body
LE: loop exit
PB: predicated region body
PF: predicated region fallthrough
CT: control target
= control target key end

     0   :  { %8 = vsyncpa [#allocation3], 0  ;;  %s1711_s0 = inlined_call_operand.vmem [shape: bf16[2,34,34,8], index: 0, kind: input, shape index: {}]   ;;  %s1712_s1 = inlined_call_operand.vmem [shape: bf16[9,8,64], index: 1, kind: input, shape index: {}]   ;;  %s1713_s2 = inlined_call_operand.vmem [shape: f32[1,64], index: 2, kind: input, shape index: {}]   ;;  %s1714_s3 = inlined_call_operand.hbm [shape: bf16[2,32,32,64], index: 3, kind: output, shape index: {}]  }
   0x1   :  { %10 = vsyncpa [#allocation3 + $0x1], 0  ;;  %s1458_s12 = smov 0   ;;  %s1460_s13 = smov 0  }
   0x2   :  { %s1462_s14 = smov 0   ;;  %s1464_s15 = smov 0  }
   0x3   :  { %s1466_s16 = smov 0   ;;  %s1468_s17 = smov 0  }
   0x4   :  { %s1470_s18 = smov 0   ;;  %s1472_s19 = smov 0  }
   0x5 LB: > { %s1097_s20 = sadd.s32 4294967295, %s1433_s19   ;;  %s1098_s21 = sadd.s32 4294967294, %s1433_s19   ;;  %s1433_s19 = sphi %s1472_s19, %s16_s19   ;;  %s1429_s18 = sphi %s1470_s18, %s1723_s18   ;;  %s1425_s17 = sphi %s1468_s17, %s1722_s17   ;;  %s1421_s16 = sphi %s1466_s16, %s1721_s16   ;;  %s1417_s15 = sphi %s1464_s15, %s1720_s15   ;;  %s1413_s14 = sphi %s1462_s14, %s1719_s14   ;;  %s1409_s13 = sphi %s1460_s13, %s1718_s13   ;;  %s1405_s12 = sphi %s1458_s12, %s1717_s12  }
   0x6   : > { %s28_s22 = sadd.s32 1, %s1425_s17  ;;  %s35_s23 = sadd.s32 1, %s1429_s18 }
   0x7   : > { %p29_p0 = scmp.ge.s32.totalorder %s28_s22, 32  ;;  %p134_p1 = scmp.ne.s32.totalorder %s1413_s14, %s1409_s13 }
   0x8   : > { %p135_p2 = scmp.eq.s32.totalorder %s1097_s20, 63  ;;  %p140_p5 = scmp.ne.s32.totalorder %s1409_s13, %s1405_s12 }
   0x9   : > { %s1725_s22 = smov (%p29_p0, %s28_s22), 0  ;;  %s1727_s23 = smov (!%p29_p0, %s35_s23), %s1429_s18 }
   0xa   : > { %s118_s24 = ssub.s32 %s1425_s17, %s1725_s22  ;;  %p1509_p3 = por %p135_p2, %p134_p1 }
   0xb   : > { %p37_p4 = scmp.ge.s32.totalorder %s1727_s23, 2  ;;  %p141_p6 = scmp.eq.s32.totalorder %s1098_s21, 63 }
   0xc   : > { %p1103_p7 = scmp.ge.s32.totalorder %s1433_s19, 1  ;;  %p180_p9 = scmp.lt.s32.totalorder %s1433_s19, 65 }
   0xd   : > { %s1729_s23 = smov (%p37_p4, %s1727_s23), 0  ;;  %p1518_p8 = por %p141_p6, %p140_p5 }
   0xe   : > { %s117_s27 = ssub.s32 %s1429_s18, %s1729_s23  ;;  %s124_s28 = sadd.s32 1, %s1413_s14 }
   0xf   : > { %s119_s29 = sor.u32 %s118_s24, %s117_s27  ;;  %p181_p10 = pnand %p1103_p7, %p180_p9 }
  0x10   : > { %p122_p11 = scmp.eq.s32.totalorder %s119_s29, 0  ;;  %p211_p12 = scmp.lt.s32.totalorder (!%p181_p10), %s1421_s16, 1 }
  0x11   : > { %184 = sbr.rel (%p181_p10) target bundleno = 290 (0x122), region = 32  ;;  %s208_s27 = sand.u32 (!%p181_p10), 1, %s1409_s13  }
  0x12   : > { %s1527_s30 = scalar_select %p122_p11, %s1413_s14, %s124_s28  }
  0x13   : > { %s1163_s21 = smul.u32 (!%p181_p10), 20, %s1417_s15  ;;  %s1158_s5 = sshll.u32 (!%p181_p10), %s1417_s15, 2 }
  0x14   : > { %s1159_s6 = sshll.u32 (!%p181_p10), %s1421_s16, 7  ;;  %s1660_s20 = scalar_lea.sflag (!%p181_p10), [#allocation3], %s208_s27 }
  0x15   : > { %s979_s7 = sadd.s32 (!%p181_p10), %s1159_s6, %s1158_s5 }
  0x16   : > { %v1107_v0 = vld [vmem:[%s1712_s1 + $0x4] sm:$0xf]  ;;  %vm276_vm0 = vcmask 1043456   ;;  %v232_v1 = vld [vmem:[%s1712_s1] sm:$0xf]  ;;  %s212_s8 = scalar_select %p211_p12, %s1421_s16, 1 }
  0x17   : > { %1249 = vmatprep.subr.msk.bf16.mxu0 %vm276_vm0, %v1107_v0  ;;  %v278_v2 = vsel %vm276_vm0, %v1107_v0, 0  ;;  %1250 = vmatprep.subr.msk.bf16.mxu1 %vm276_vm0, %v232_v1  ;;  %v334_v3 = vsel %vm276_vm0, %v232_v1, 0  ;;  %v1115_v4 = vld [vmem:[%s1712_s1 + $0x8] sm:$0xf]  ;;  %v1123_v5 = vld [vmem:[%s1712_s1 + $0xc] sm:$0xf] }
  0x18   : > { %1196 = vmatpush3.bf16.msra.mxu0 %v278_v2  ;;  %1202 = vmatpush3.bf16.msra.mxu1 %v334_v3  ;;  %s1258_s24 = smul.u32 680, %s212_s8  ;;  %vm248_vm1 = vsmask.f32 7424  ;;  %vm269_vm2 = vcmask 64512   ;;  %v483_v8 = vsel %vm276_vm0, %v1123_v5, 0  ;;  %vm387_vm3 = vcmask 1046528  }
  0x19   : > { %1251 = vmatprep.subr.msk.bf16.mxu0 %vm276_vm0, %v1115_v4  ;;  %1252 = vmatprep.subr.msk.bf16.mxu1 %vm276_vm0, %v1123_v5  ;;  %v1132_v9 = vld [vmem:[%s1712_s1 + $0x14] sm:$0xf]  ;;  %v400_v29 = vsel %vm276_vm0, %v1115_v4, 0  ;;  %v1128_v37 = vld [vmem:[%s1712_s1 + $0x10] sm:$0xf]  ;;  %vm960_vm4 = vcmask 519168  }
  0x1a   : > { %s215_s29 = scalar_lea.vmem %s1711_s0, %s1258_s24  ;;  %v637_v38 = vsel %vm276_vm0, %v1132_v9, 0  ;;  %v1145_v41 = vld [vmem:[%s1712_s1 + $0x1c] sm:$0xf]  ;;  %v568_v56 = vsel %vm276_vm0, %v1128_v37, 0  ;;  %v1140_v58 = vld [vmem:[%s1712_s1 + $0x18] sm:$0xf] }
  0x1b   : > { %s1553_s4 = scalar_lea.vmem %s215_s29, %s1163_s21  ;;  %v805_v62 = vsel %vm276_vm0, %v1145_v41, 0  ;;  %v720_v5 = vsel %vm276_vm0, %v1140_v58, 0  ;;  %s1160_s15 = sshll.u32 %s979_s7, 6 }
  0x1c   : > { %v1332_v6 = vld [vmem:[%s1553_s4] sm:$0xff]   ;;  %v1557_v7 = vld [vmem:[%s1553_s4 + $0x8] sm:$0xff]   ;;  %v1334_v10 = vld [vmem:[%s1553_s4 + $0x10] ss:$0 sps:$4 sm:$0x11]   ;;  %s1652_s11 = scalar_lea.hbm %s1714_s3, %s1160_s15  ;;  %s1435_s24 = smov [#allocation2]  }
  0x1d   : > { %v1335_v11 = vld [vmem:[%s1553_s4 + $0x14] sm:$0xff]   ;;  %v250_v12 = vshrl.u32 %v1332_v6, 16  ;;  %v252_v13 = vshll.u32 %v1332_v6, 16  ;;  %v257_v14 = vshll.u32 %v1557_v7, 16  ;;  %v261_v15 = vshrl.u32 %v1557_v7, 16  ;;  %1203 = vmatprep.mubr.msk.bf16.mxu1 %vm269_vm2, %v1332_v6  ;;  %v1336_v22 = vld [vmem:[%s1553_s4 + $0x1c] sm:$0xff]  }
  0x1e   : > { %v265_v16 = vshll.u32 %v1334_v10, 16  ;;  %1204 = vmatmul.mubr.msk.bf16.vlgmr.msra.gmra.mxu1 %vm269_vm2, %v1557_v7  ;;  %v388_v17 = vrot.slane %v1332_v6, 1  ;;  %v389_v18 = vrot.slane %v1557_v7, 1  ;;  %v1575_v23 = vld [vmem:[%s1553_s4 + $0x28] sm:$0xff]   ;;  %v545_v26 = vshll.u32 %v1335_v11, 16  ;;  %v1578_v28 = vld [vmem:[%s1553_s4 + $0x30] sm:$0xff]  }
  0x1f   : > { %v254_v19 = vrot.slane %v252_v13, 1  ;;  %v259_v20 = vrot.slane %v257_v14, 1  ;;  %1214 = vmatpush3.bf16.msra.mxu1 %v483_v8  ;;  %1215 = vmatprep.mubr.msk.bf16.mxu1 %vm269_vm2, %v1335_v11  ;;  %v625_v27 = vrot.slane %v1335_v11, 1  ;;  %v543_v31 = vshrl.u32 %v1335_v11, 16  ;;  %v1149_v6 = vld [vmem:[%s1712_s1 + $0x20] sm:$0xf] }
  0x20   : > { %v267_v21 = vrot.slane %v265_v16, 1  ;;  %1254 = vmatprep.subr.msk.bf16.mxu1 %vm276_vm0, %v1132_v9  ;;  %v390_v30 = vsel %vm387_vm3, %v388_v17, %v389_v18  ;;  %v626_v32 = vrot.slane %v1336_v22, 1  ;;  %v547_v35 = vrot.slane %v545_v26, 1  ;;  %v1337_v45 = vld [vmem:[%s1553_s4 + $0x24] ss:$0 sps:$4 sm:$0x11]  }
  0x21   : > { %v255_v24 = vor.u32 %v254_v19, %v250_v12  ;;  %v263_v25 = vor.u32 %v261_v15, %v259_v20  ;;  %v549_v36 = vshll.u32 %v1336_v22, 16  ;;  %v782_v39 = vshll.u32 %v1575_v23, 16  ;;  %v1340_v50 = vld [vmem:[%s1553_s4 + $0x38] ss:$0 sps:$4 sm:$0x11]   ;;  %s1104_s4 = sshll.u32 %s208_s27, 4 }
  0x22   : > { %v627_v40 = vsel %vm387_vm3, %v625_v27, %v626_v32  ;;  %v780_v42 = vshrl.u32 %v1575_v23, 16  ;;  %v786_v43 = vshll.u32 %v1578_v28, 16  ;;  %v391_v44 = vrot.slane %v1334_v10, 1  ;;  %s210_s8 = scalar_lea.vmem [#allocation2], %s1104_s4  ;;  %s1345_s28 = sshll.u32 %s1435_s24, 4  ;;  %s1346_s28 = int_to_ptr.vmem [resolvable:$false] %s1345_s28 }
  0x23   : > { %v260_v33 = vsel %vm248_vm1, %v255_v24, %v259_v20  ;;  %v268_v34 = vsel %vm248_vm1, %v263_v25, %v267_v21  ;;  %v784_v46 = vrot.slane %v782_v39, 1  ;;  %v548_v47 = vor.u32 %v547_v35, %v543_v31  ;;  %s982_s16 = sshll.u32 %s210_s8, 4  ;;  %s1347_s29 = scalar_lea.vmem %s1346_s28, 512  ;;  %s1654_s16 = int_to_ptr.vmem [resolvable:$true] %s982_s16 }
  0x24   : > { %1197 = vmatprep.mubr.msk.bf16.mxu0 %vm269_vm2, %v260_v33  ;;  %v551_v48 = vrot.slane %v549_v36, 1  ;;  %v628_v49 = vrot.slane %v1337_v45, 1  ;;  %v788_v52 = vrot.slane %v786_v43, 1  ;;  %v392_v53 = vsel %vm387_vm3, %v389_v18, %v391_v44  ;;  %s1341_s21 = scalar_lea.vmem %s1654_s16, 256  ;;  %p1348_p2 = scmp.lt.s32.totalorder %s1654_s16, %s1346_s28 }
  0x25   : > { %1198 = vmatmul.mubr.msk.bf16.vlgmr.msra.gmra.mxu0 %vm269_vm2, %v268_v34  ;;  %v785_v51 = vor.u32 %v784_v46, %v780_v42  ;;  %v553_v54 = vshrl.u32 %v1336_v22, 16  ;;  %v557_v55 = vshll.u32 %v1337_v45, 16  ;;  %v790_v60 = vshrl.u32 %v1578_v28, 16  ;;  %p1342_p13 = scmp.ne.s32.totalorder %s1654_s16, %s1341_s21  ;;  %p1349_p4 = scmp.lt.s32.totalorder %s1347_s29, %s1341_s21 }
  0x26   : > { %1208 = vmatpush3.bf16.msra.mxu0 %v400_v29  ;;  %1209 = vmatprep.mubr.msk.bf16.mxu0 %vm269_vm2, %v390_v30  ;;  %v552_v57 = vsel %vm248_vm1, %v548_v47, %v551_v48  ;;  %v629_v59 = vsel %vm387_vm3, %v626_v32, %v628_v49  ;;  %v794_v61 = vshll.u32 %v1340_v50, 16  ;;  %v862_v8 = vrot.slane %v1575_v23, 1 }
  0x27   : > { %1253 = vmatprep.subr.msk.bf16.mxu0 %vm276_vm0, %v1128_v37  ;;  %1216 = vmatmul.mubr.msk.bf16.vlgmr.msra.gmra.mxu1 %vm269_vm2, %v1336_v22  ;;  %v789_v63 = vsel %vm248_vm1, %v785_v51, %v788_v52  ;;  %v555_v0 = vor.u32 %v553_v54, %v551_v48  ;;  %v559_v1 = vrot.slane %v557_v55, 1  ;;  %v792_v2 = vor.u32 %v790_v60, %v788_v52  ;;  %p1343_p0 = pnand %p1342_p13, %p1509_p3  ;;  %p1350_p5 = por %p1349_p4, %p1348_p2 }
  0x28   : > { %1226 = vmatpush3.bf16.msra.mxu1 %v637_v38  ;;  %1227 = vmatprep.mubr.msk.bf16.mxu1 %vm269_vm2, %v627_v40  ;;  %v796_v3 = vrot.slane %v794_v61, 1  ;;  %v863_v9 = vrot.slane %v1578_v28, 1  ;;  %v874_v10 = vsel %vm276_vm0, %v1149_v6, 0  ;;  %v865_v12 = vrot.slane %v1340_v50, 1 }
  0x29   : > { %1256 = vmatprep.subr.msk.bf16.mxu1 %vm276_vm0, %v1145_v41  ;;  %v560_v4 = vsel %vm248_vm1, %v555_v0, %v559_v1  ;;  %p1344_p1 = pneg %p1343_p0 }
  0x2a   : > { %v797_v7 = vsel %vm248_vm1, %v792_v2, %v796_v3  ;;  %v864_v11 = vsel %vm387_vm3, %v862_v8, %v863_v9  ;;  %v866_v13 = vsel %vm387_vm3, %v863_v9, %v865_v12 }
  0x2b   : > { %p1351_p6 = pnand %p1350_p5, %p1344_p1 }
  0x2d   : > { %1210 = vmatmul.mubr.msk.bf16.vlgmr.msra.gmra.mxu0 %vm269_vm2, %v392_v53 }
  0x2e   : > { %1220 = vmatpush3.bf16.msra.mxu0 %v568_v56  ;;  %1221 = vmatprep.mubr.msk.bf16.mxu0 %vm269_vm2, %v552_v57 }
  0x2f   : > { %1255 = vmatprep.subr.msk.bf16.mxu0 %vm276_vm0, %v1140_v58  ;;  %1228 = vmatmul.mubr.msk.bf16.vlgmr.msra.gmra.mxu1 %vm269_vm2, %v629_v59 }
  0x30   : > { %1238 = vmatpush3.bf16.msra.mxu1 %v805_v62  ;;  %1239 = vmatprep.mubr.msk.bf16.mxu1 %vm269_vm2, %v789_v63 }
  0x35   : > { %1222 = vmatmul.mubr.msk.bf16.vlgmr.msra.gmra.mxu0 %vm269_vm2, %v560_v4 }
  0x36   : > { %1232 = vmatpush3.bf16.msra.mxu0 %v720_v5  ;;  %1233 = vmatprep.mubr.msk.bf16.mxu0 %vm269_vm2, %v1575_v23 }
  0x37   : > { %1257 = vmatprep.subr.msk.bf16.mxu0 %vm276_vm0, %v1149_v6  ;;  %1240 = vmatmul.mubr.msk.bf16.vlgmr.msra.gmra.mxu1 %vm269_vm2, %v797_v7  ;;  %v1152_v6 = vld [vmem:[%s1713_s2] ss:$0 sm:$0xff] }
  0x3d   : > { %1234 = vmatmul.mubr.msk.bf16.vlgmr.msra.gmra.mxu0 %vm269_vm2, %v1578_v28 }
  0x3e   : > { %1244 = vmatpush3.bf16.msra.mxu0 %v874_v10  ;;  %1245 = vmatprep.mubr.msk.bf16.mxu0 %vm269_vm2, %v864_v11 }
  0x45   : > { %1246 = vmatmul.mubr.msk.bf16.vlgmr.msra.gmra.mxu0 %vm269_vm2, %v866_v13 }
  0xde   : > { %v1205_v14 = vpop.f32.mrf.mxu1 }
  0xe0   : > { %v370_v15 = vpop.f32.mrf.mxu1 }
  0xe2   : > { %v1206_v16 = vpop.f32.mrf.mxu1 }
  0xe4   : > { %v373_v17 = vpop.f32.mrf.mxu1 }
  0xe5   : > { %v1199_v18 = vpop.f32.mrf.mxu0 }
  0xe6   : > { %v379_v31 = vadd.f32 %v1205_v14, %v1199_v18 }
  0xe7   : > { %v314_v19 = vpop.f32.mrf.mxu0  ;;  %v1217_v20 = vpop.f32.mrf.mxu1 }
  0xe8   : > { %v371_v33 = vadd.f32 %v370_v15, %v314_v19 }
  0xe9   : > { %v1200_v21 = vpop.f32.mrf.mxu0  ;;  %v519_v22 = vpop.f32.mrf.mxu1 }
  0xea   : > { %v382_v37 = vadd.f32 %v1206_v16, %v1200_v21 }
  0xeb   : > { %v317_v23 = vpop.f32.mrf.mxu0  ;;  %v1218_v24 = vpop.f32.mrf.mxu1 }
  0xec   : > { %v374_v40 = vadd.f32 %v373_v17, %v317_v23 }
  0xed   : > { %v1211_v25 = vpop.f32.mrf.mxu0  ;;  %v522_v26 = vpop.f32.mrf.mxu1 }
  0xee   : > { %v453_v34 = vadd.f32 %v1211_v25, %v379_v31 }
  0xef   : > { %v436_v27 = vpop.f32.mrf.mxu0  ;;  %v1229_v28 = vpop.f32.mrf.mxu1 }
  0xf0   : > { %v451_v38 = vadd.f32 %v436_v27, %v371_v33  ;;  %v536_v41 = vadd.f32 %v1217_v20, %v453_v34 }
  0xf1   : > { %v1212_v29 = vpop.f32.mrf.mxu0  ;;  %v673_v30 = vpop.f32.mrf.mxu1 }
  0xf2   : > { %v454_v42 = vadd.f32 %v1212_v29, %v382_v37  ;;  %v534_v45 = vadd.f32 %v519_v22, %v451_v38 }
  0xf3   : > { %v439_v32 = vpop.f32.mrf.mxu0  ;;  %v1230_v36 = vpop.f32.mrf.mxu1 }
  0xf4   : > { %v452_v46 = vadd.f32 %v439_v32, %v374_v40  ;;  %v537_v49 = vadd.f32 %v1218_v24, %v454_v42 }
  0xf5   : > { %v1223_v35 = vpop.f32.mrf.mxu0  ;;  %v676_v44 = vpop.f32.mrf.mxu1 }
  0xf6   : > { %v621_v47 = vadd.f32 %v1223_v35, %v536_v41  ;;  %v535_v53 = vadd.f32 %v522_v26, %v452_v46 }
  0xf7   : > { %v604_v39 = vpop.f32.mrf.mxu0  ;;  %v1241_v52 = vpop.f32.mrf.mxu1 }
  0xf8   : > { %v619_v50 = vadd.f32 %v604_v39, %v534_v45  ;;  %v690_v54 = vadd.f32 %v1229_v28, %v621_v47 }
  0xf9   : > { %v1224_v43 = vpop.f32.mrf.mxu0  ;;  %v841_v60 = vpop.f32.mrf.mxu1 }
  0xfa   : > { %v622_v55 = vadd.f32 %v1224_v43, %v537_v49  ;;  %v688_v57 = vadd.f32 %v673_v30, %v619_v50 }
  0xfb   : > { %v607_v48 = vpop.f32.mrf.mxu0  ;;  %v1242_v4 = vpop.f32.mrf.mxu1 }
  0xfc   : > { %v620_v58 = vadd.f32 %v607_v48, %v535_v53  ;;  %v691_v62 = vadd.f32 %v1230_v36, %v622_v55 }
  0xfd   : > { %v1235_v51 = vpop.f32.mrf.mxu0  ;;  %v844_v14 = vpop.f32.mrf.mxu1 }
  0xfe   : > { %v773_v59 = vadd.f32 %v1235_v51, %v690_v54  ;;  %v689_v1 = vadd.f32 %v676_v44, %v620_v58 }
  0xff   : > { %v756_v56 = vpop.f32.mrf.mxu0 }
 0x100   : > { %v771_v63 = vadd.f32 %v756_v56, %v688_v57  ;;  %v858_v2 = vadd.f32 %v1241_v52, %v773_v59 }
 0x101   : > { %v1236_v61 = vpop.f32.mrf.mxu0 }
 0x102   : > { %v774_v3 = vadd.f32 %v1236_v61, %v691_v62  ;;  %v856_v7 = vadd.f32 %v841_v60, %v771_v63 }
 0x103   : > { %v759_v0 = vpop.f32.mrf.mxu0 }
 0x104   : > { %v772_v8 = vadd.f32 %v759_v0, %v689_v1  ;;  %v859_v11 = vadd.f32 %v1242_v4, %v774_v3 }
 0x105   : > { %v1247_v5 = vpop.f32.mrf.mxu0 }
 0x106   : > { %v927_v9 = vadd.f32 %v1247_v5, %v858_v2  ;;  %v857_v16 = vadd.f32 %v844_v14, %v772_v8 }
 0x107   : > { %v910_v10 = vpop.f32.mrf.mxu0 }
 0x108   : > { %v938_v12 = vadd.f32 %v1152_v6, %v927_v9  ;;  %v925_v13 = vadd.f32 %v910_v10, %v856_v7 }
 0x109   : > { %v1248_v15 = vpop.f32.mrf.mxu0 }
 0x10a   : > { %v942_v17 = vmax.f32 %v938_v12, 0.0  ;;  %v936_v18 = vadd.f32 %v1152_v6, %v925_v13  ;;  %v928_v19 = vadd.f32 %v1248_v15, %v859_v11 }
 0x10b   : > { %v913_v20 = vpop.f32.mrf.mxu0 }
 0x10c   : > { %v1166_v21 = vpack.c.bf16 %v942_v17, %v942_v17  ;;  %v940_v22 = vmax.f32 %v936_v18, 0.0  ;;  %v939_v23 = vadd.f32 %v1152_v6, %v928_v19  ;;  %v926_v24 = vadd.f32 %v913_v20, %v857_v16 }
 0x10e   : > { %963 = vst.msk [vmem:[%s210_s8 + $0x8] sm:$0xf] %vm960_vm4, %v1166_v21  ;;  %v1164_v25 = vpack.c.bf16 %v940_v22, %v940_v22  ;;  %v943_v26 = vmax.f32 %v939_v23, 0.0  ;;  %v937_v27 = vadd.f32 %v1152_v6, %v926_v24 }
 0x110   : > { %961 = vst.msk [vmem:[%s210_s8] sm:$0xf] %vm960_vm4, %v1164_v25  ;;  %v1167_v28 = vpack.c.bf16 %v943_v26, %v943_v26  ;;  %v941_v29 = vmax.f32 %v937_v27, 0.0 }
 0x112   : > { %964 = vst.msk [vmem:[%s210_s8 + $0xc] sm:$0xf] %vm960_vm4, %v1167_v28  ;;  %v1165_v30 = vpack.c.bf16 %v941_v29, %v941_v29 }
 0x114   : > { %962 = vst.msk [vmem:[%s210_s8 + $0x4] sm:$0xf] %vm960_vm4, %v1165_v30 }
 0x115   : > { %1354 = shalt.err (!%p1351_p6)
}
 0x116   : > { %s1355_s27 = scalar_lea.hbm %s1652_s11, 256  ;;  %s1359_s6 = scalar_lea.hbm %s1714_s3, 16384 }
 0x117   : > { %p1356_p7 = scmp.ne.s32.totalorder %s1652_s11, %s1355_s27  ;;  %p1360_p11 = scmp.lt.s32.totalorder %s1652_s11, %s1714_s3 }
 0x118   : > { %p1361_p12 = scmp.lt.s32.totalorder %s1359_s6, %s1355_s27 }
 0x119   : > { %p1357_p9 = pnand %p1356_p7, %p1509_p3 }
 0x11a   : > { %p1362_p13 = por %p1361_p12, %p1360_p11 }
 0x11b   : > { %p1358_p10 = pneg %p1357_p9 }
 0x11d   : > { %p1363_p0 = pnand %p1362_p13, %p1358_p10 }
 0x11f   : > { %1366 = shalt.err (!%p1363_p0)
}
 0x120   : > { %s1436_s15 = smov 64   ;;  %s1437_s9 = smov 4  }
 0x121   : > { %1259 = dma.vmem_to_hbm [thread:$0]  (%p1509_p3), %s1654_s16, 256, %s1652_s11, %s1660_s20, %s1436_s15, %s1436_s15, %s1437_s9  }
 0x122 PF: > { %p1265_p1 = scmp.ge.s32.totalorder %s1433_s19, 2  ;;  %s997_s10 = sand.u32 1, %s1405_s12  }
 0x123   : > { %s998_s21 = scalar_lea.sflag [#allocation3], %s997_s10 }
 0x124   : > { %p1262_p2 = pnand %p1265_p1, %p1518_p8 }
 0x126   : > { %p1263_p4 = pneg %p1262_p2 }
 0x128   : > { %1400 = dma.done.wait (%p1263_p4), %s998_s21, 256  }
 0x129   : > { %1402 = vsyncadd (%p1263_p4), %s998_s21, 4294967040  ;;  %s16_s19 = sadd.s32 1, %s1433_s19   ;;  %s1717_s12 = smov %s1409_s13 }
 0x12a   : > { %p13_p5 = scmp.ge.s32.totalorder %s16_s19, 66   ;;  %s1718_s13 = smov %s1413_s14 }
 0x12b   : > { %s1719_s14 = smov %s1527_s30  ;;  %s1720_s15 = smov %s1425_s17 }
 0x12c   : > { %s1721_s16 = smov %s1429_s18  ;;  %s1722_s17 = smov %s1725_s22 }
 0x12d   : > { %s1723_s18 = smov %s1729_s23  ;;  %15 = sbr.rel (!%p13_p5) target bundleno = 5 (0x5), region = 84 }
 0x132   :  { %1003 = vsyncpa [#allocation3], 1 }
 0x133   :  { %1005 = vsyncpa [#allocation3 + $0x1], 1 }

</bundles_post_ra>
